<compile_context>
chip_gen: v7x
topology: tpu7x:2x2x1
jax: 0.10.0
libtpu: 0.0.40
codegen_flags: <defaults>
</compile_context>

<pallas_src>
import functools

import jax
import jax.numpy as jnp
from jax.experimental import pallas as pl
from jax.experimental.pallas import tpu as pltpu

LANE = 128
SUBLANE = 8


def _round_up(x, m):
    return (x + m - 1) // m * m


def _actor_critic_kernel(action_size, hp,
                         x_ref,
                         w1_ref, b1_ref,
                         w2a_ref, w2c_ref, b2a_ref, b2c_ref,
                         w3a_ref, w3c_ref, b3_ref,
                         out_ref):
    """Fused (actor | critic) MLP on one batch tile.

    x_ref : (TB, S)           unpadded states (S equals full array dim)
    w1    : (S, 2*Hp)         [aw1 | cw1]   (column-concatenated, lane-dense)
    w2a/c : (Hp, Hp)          per-branch layer-2 weights (no block-diag zeros)
    w3a/c : (Hp, OUTp)        per-branch heads summed into the packed output slab
    out   : (TB, OUTp)        cols [0:A]=tanh(actor), col [A]=value, rest padding
    """
    x = x_ref[...]
    wdt = w1_ref.dtype  # MXU operand dtype (f32 or bf16)

    # Layer 1: fused wide matmul (contraction over the small, unpadded state dim).
    h = jnp.dot(x.astype(wdt), w1_ref[...],
                preferred_element_type=jnp.float32) + b1_ref[...]
    h = jnp.maximum(h, 0.0)

    # Layer 2: two lane-aligned matmuls instead of one 50%-zero block-diagonal one.
    ha = h[:, :hp]
    hc = h[:, hp:]
    ha = jnp.maximum(jnp.dot(ha.astype(wdt), w2a_ref[...],
                             preferred_element_type=jnp.float32) + b2a_ref[...], 0.0)
    hc = jnp.maximum(jnp.dot(hc.astype(wdt), w2c_ref[...],
                             preferred_element_type=jnp.float32) + b2c_ref[...], 0.0)

    # Layer 3: actor head (cols [0:A]) and critic head (col [A]) summed into one slab.
    z = (jnp.dot(ha.astype(wdt), w3a_ref[...], preferred_element_type=jnp.float32)
         + jnp.dot(hc.astype(wdt), w3c_ref[...], preferred_element_type=jnp.float32)
         + b3_ref[...])

    # tanh only on the actor columns [0:A]; value column / padding pass through.
    col = jax.lax.broadcasted_iota(jnp.int32, z.shape, 1)
    out_ref[...] = jnp.where(col < action_size, jnp.tanh(z), z).astype(out_ref.dtype)


def pack_params(params, param_dtype=jnp.float32):
    """Fuse actor+critic layers into lane-dense padded weights (done once, host side)."""
    aw1, ab1 = params["aw1"], params["ab1"]
    aw2, ab2 = params["aw2"], params["ab2"]
    aw3, ab3 = params["aw3"], params["ab3"]
    cw1, cb1 = params["cw1"], params["cb1"]
    cw2, cb2 = params["cw2"], params["cb2"]
    cw3, cb3 = params["cw3"], params["cb3"]

    S, H = aw1.shape
    A = aw3.shape[1]

    Hp = _round_up(H, LANE)          # padded hidden per branch (lane-dense)
    H2 = 2 * Hp                      # fused layer-1 output width
    OUTp = _round_up(A + 1, LANE)    # packed output slab: mu | value | padding

    # Layer 1: [aw1 | cw1]  (state dim stays UNPADDED; padded output cols are zero)
    w1 = jnp.zeros((S, H2), jnp.float32)
    w1 = w1.at[:, :H].set(aw1).at[:, Hp:Hp + H].set(cw1)
    b1 = jnp.zeros((1, H2), jnp.float32)
    b1 = b1.at[:, :H].set(ab1).at[:, Hp:Hp + H].set(cb1)

    # Layer 2: two separate per-branch weights (no block-diagonal zeros)
    w2a = jnp.zeros((Hp, Hp), jnp.float32).at[:H, :H].set(aw2)
    w2c = jnp.zeros((Hp, Hp), jnp.float32).at[:H, :H].set(cw2)
    b2a = jnp.zeros((1, Hp), jnp.float32).at[:, :H].set(ab2)
    b2c = jnp.zeros((1, Hp), jnp.float32).at[:, :H].set(cb2)

    # Layer 3: actor head -> cols [0:A], critic head -> col [A]; summed in-kernel.
    w3a = jnp.zeros((Hp, OUTp), jnp.float32).at[:H, :A].set(aw3)
    w3c = jnp.zeros((Hp, OUTp), jnp.float32).at[:H, A:A + 1].set(cw3)
    b3 = jnp.zeros((1, OUTp), jnp.float32)
    b3 = b3.at[:, :A].set(ab3).at[:, A:A + 1].set(cb3)

    return dict(
        w1=w1.astype(param_dtype), b1=b1,
        w2a=w2a.astype(param_dtype), w2c=w2c.astype(param_dtype), b2a=b2a, b2c=b2c,
        w3a=w3a.astype(param_dtype), w3c=w3c.astype(param_dtype), b3=b3,
        log_std=params["log_std"],
        state_size=S, action_size=A, hidden_size=H,
        padded_hidden=Hp, padded_out=OUTp,
    )


def _nbytes(a):
    return int(a.size) * int(jnp.dtype(a.dtype).itemsize)


def actor_critic_forward(states, packed, tile_batch=2048, min_parallel_tiles=2,
                         out_dtype=jnp.float32):
    """states: (B, state_size) float32. packed: output of pack_params.
    Returns (mu, std, values) with mu/std: (B, action_size), values: (B, 1)."""
    B, S = states.shape
    assert S == packed["state_size"]
    A = packed["action_size"]
    Hp = packed["padded_hidden"]
    H2 = 2 * Hp
    OUTp = packed["padded_out"]

    # ---- batch tile sizing ----------------------------------------------------
    # Balanced tiles (waste <= 7 rows) instead of fixed TB + round_up(B, TB).
    # Force grid >= 2 (and even) when the batch is big enough so both v7x
    # TensorCores get work under dimension_semantics=("parallel",).
    num_tiles = max(1, pl.cdiv(B, tile_batch))
    if min_parallel_tiles > 1 and B >= min_parallel_tiles * SUBLANE:
        num_tiles = max(num_tiles, min_parallel_tiles)
        num_tiles = _round_up(num_tiles, 2)
    TB = _round_up(pl.cdiv(B, num_tiles), SUBLANE)
    Bp = TB * num_tiles

    # No lane padding of the states (the layer-1 contraction runs at K = S);
    # only pad the handful of trailing batch rows needed to fill the last tile.
    x = states.astype(jnp.float32)
    if Bp != B:
        x = jnp.pad(x, ((0, Bp - B), (0, 0)))

    # ---- VMEM budget & cost hints ---------------------------------------------
    weight_keys = ("w1", "b1", "w2a", "w2c", "b2a", "b2c", "w3a", "w3c", "b3")
    weight_bytes = sum(_nbytes(packed[k]) for k in weight_keys)
    tile_io_bytes = TB * (S * 4 + OUTp * int(jnp.dtype(out_dtype).itemsize))
    interm_bytes = TB * H2 * 4 * 2                 # layer-1 / layer-2 activations (f32)
    needed = 2 * weight_bytes + 2 * tile_io_bytes + interm_bytes + (4 << 20)
    vmem_limit = int(min(max(needed, 32 << 20), 120 << 20))

    flops = 2 * Bp * (S * H2 + 2 * Hp * Hp + 2 * Hp * OUTp)
    cost = pl.CostEstimate(
        flops=int(flops),
        transcendentals=int(Bp * A),
        bytes_accessed=int(Bp * S * 4 + Bp * OUTp * int(jnp.dtype(out_dtype).itemsize)
                           + weight_bytes),
    )

    kernel = functools.partial(_actor_critic_kernel, A, Hp)

    out = pl.pallas_call(
        kernel,
        out_shape=jax.ShapeDtypeStruct((Bp, OUTp), out_dtype),
        grid=(num_tiles,),
        in_specs=[
            pl.BlockSpec((TB, S), lambda i: (i, 0)),        # x: tiled over batch
            pl.BlockSpec((S, H2), lambda i: (0, 0)),        # w1: VMEM-resident
            pl.BlockSpec((1, H2), lambda i: (0, 0)),        # b1
            pl.BlockSpec((Hp, Hp), lambda i: (0, 0)),       # w2a
            pl.BlockSpec((Hp, Hp), lambda i: (0, 0)),       # w2c
            pl.BlockSpec((1, Hp), lambda i: (0, 0)),        # b2a
            pl.BlockSpec((1, Hp), lambda i: (0, 0)),        # b2c
            pl.BlockSpec((Hp, OUTp), lambda i: (0, 0)),     # w3a
            pl.BlockSpec((Hp, OUTp), lambda i: (0, 0)),     # w3c
            pl.BlockSpec((1, OUTp), lambda i: (0, 0)),      # b3
        ],
        out_specs=pl.BlockSpec((TB, OUTp), lambda i: (i, 0)),
        compiler_params=pltpu.CompilerParams(
            dimension_semantics=("parallel",),              # shard batch over TCs (v7x)
            vmem_limit_bytes=vmem_limit,
        ),
        cost_estimate=cost,
    )(x, packed["w1"], packed["b1"],
      packed["w2a"], packed["w2c"], packed["b2a"], packed["b2c"],
      packed["w3a"], packed["w3c"], packed["b3"])

    mu = out[:B, :A].astype(jnp.float32)
    values = out[:B, A:A + 1].astype(jnp.float32)
    # std is batch-independent -> computed once here, never inside the grid loop.
    std = jnp.broadcast_to(jnp.exp(packed["log_std"]), mu.shape)
    return mu, std, values


def init_params(key, state_size, action_size, hidden_size, std=0.0):
    """PyTorch-style Linear init (U[-1/sqrt(fan_in), 1/sqrt(fan_in)]), weights stored (in, out)."""
    def linear(k, fan_in, fan_out):
        kw, kb = jax.random.split(k)
        bound = 1.0 / jnp.sqrt(fan_in)
        w = jax.random.uniform(kw, (fan_in, fan_out), jnp.float32, -bound, bound)
        b = jax.random.uniform(kb, (1, fan_out), jnp.float32, -bound, bound)
        return w, b

    keys = jax.random.split(key, 6)
    aw1, ab1 = linear(keys[0], state_size, hidden_size)
    aw2, ab2 = linear(keys[1], hidden_size, hidden_size)
    aw3, ab3 = linear(keys[2], hidden_size, action_size)
    cw1, cb1 = linear(keys[3], state_size, hidden_size)
    cw2, cb2 = linear(keys[4], hidden_size, hidden_size)
    cw3, cb3 = linear(keys[5], hidden_size, 1)
    log_std = jnp.ones((1, action_size), jnp.float32) * std

    return dict(
        aw1=aw1, ab1=ab1, aw2=aw2, ab2=ab2, aw3=aw3, ab3=ab3,
        cw1=cw1, cb1=cb1, cw2=cw2, cb2=cb2, cw3=cw3, cb3=cb3,
        log_std=log_std,
    )


if __name__ == "__main__":
    key = jax.random.PRNGKey(0)
    k_params, k_states = jax.random.split(key)

    B, state_size, action_size, hidden_size = 2, 33, 4, 32
    params = init_params(k_params, state_size, action_size, hidden_size, std=0.0)
    states = jax.random.normal(k_states, (B, state_size), jnp.float32)

    # param_dtype=jnp.bfloat16 halves weight DMA / residency on v6e/v7x (treat it as a
    # memory win, not an MXU win); use f32 here so the f32 reference check is exact,
    # and keep f32 on v5e.
    packed = pack_params(params, param_dtype=jnp.float32)

    mu, std, values = actor_critic_forward(states, packed)
    jax.block_until_ready((mu, std, values))

    # Reference in plain JAX (unfused / unpadded).
    def ref(x, p):
        h = jnp.maximum(x @ p["aw1"] + p["ab1"], 0)
        h = jnp.maximum(h @ p["aw2"] + p["ab2"], 0)
        mu_r = jnp.tanh(h @ p["aw3"] + p["ab3"])
        g = jnp.maximum(x @ p["cw1"] + p["cb1"], 0)
        g = jnp.maximum(g @ p["cw2"] + p["cb2"], 0)
        v_r = g @ p["cw3"] + p["cb3"]
        std_r = jnp.broadcast_to(jnp.exp(p["log_std"]), mu_r.shape)
        return mu_r, std_r, v_r

    mu_r, std_r, v_r = ref(states, params)
    assert mu.shape == (B, action_size) and std.shape == (B, action_size) and values.shape == (B, 1)
    assert jnp.allclose(mu, mu_r, atol=1e-5), "mu mismatch"
    assert jnp.allclose(std, std_r, atol=1e-6), "std mismatch"
    assert jnp.allclose(values, v_r, atol=1e-5), "values mismatch"

    print("KERNEL_OK")
</pallas_src>

<mosaic_0001>
module attributes {stable_mosaic.version = 11 : i64} {
  func.func @_actor_critic_kernel(%arg0: i32, %arg1: memref<8x33xf32, #tpu.memory_space<vmem>>, %arg2: memref<33x256xf32, #tpu.memory_space<vmem>>, %arg3: memref<1x256xf32, #tpu.memory_space<vmem>>, %arg4: memref<128x128xf32, #tpu.memory_space<vmem>>, %arg5: memref<128x128xf32, #tpu.memory_space<vmem>>, %arg6: memref<1x128xf32, #tpu.memory_space<vmem>>, %arg7: memref<1x128xf32, #tpu.memory_space<vmem>>, %arg8: memref<128x128xf32, #tpu.memory_space<vmem>>, %arg9: memref<128x128xf32, #tpu.memory_space<vmem>>, %arg10: memref<1x128xf32, #tpu.memory_space<vmem>>, %arg11: memref<8x128xf32, #tpu.memory_space<vmem>>) attributes {dimension_semantics = [#tpu.dimension_semantics<parallel>], iteration_bounds = array<i64: 1>, scalar_prefetch = 0 : i64, scratch_operands = 0 : i64, tpu.core_type = #tpu.core_type<tc>, window_params = [{transform_indices = @transform_0, window_bounds = array<i64: 8, 33>}, {pipeline_mode = #tpu.pipeline_mode<synchronous>, transform_indices = @transform_1, window_bounds = array<i64: 33, 256>}, {pipeline_mode = #tpu.pipeline_mode<synchronous>, transform_indices = @transform_2, window_bounds = array<i64: 1, 256>}, {pipeline_mode = #tpu.pipeline_mode<synchronous>, transform_indices = @transform_3, window_bounds = array<i64: 128, 128>}, {pipeline_mode = #tpu.pipeline_mode<synchronous>, transform_indices = @transform_4, window_bounds = array<i64: 128, 128>}, {pipeline_mode = #tpu.pipeline_mode<synchronous>, transform_indices = @transform_5, window_bounds = array<i64: 1, 128>}, {pipeline_mode = #tpu.pipeline_mode<synchronous>, transform_indices = @transform_6, window_bounds = array<i64: 1, 128>}, {pipeline_mode = #tpu.pipeline_mode<synchronous>, transform_indices = @transform_7, window_bounds = array<i64: 128, 128>}, {pipeline_mode = #tpu.pipeline_mode<synchronous>, transform_indices = @transform_8, window_bounds = array<i64: 128, 128>}, {pipeline_mode = #tpu.pipeline_mode<synchronous>, transform_indices = @transform_9, window_bounds = array<i64: 1, 128>}, {transform_indices = @transform_10, window_bounds = array<i64: 8, 128>}]} {
    %c0 = arith.constant 0 : index
    %c0_0 = arith.constant 0 : index
    %0 = vector.load %arg1[%c0, %c0_0] : memref<8x33xf32, #tpu.memory_space<vmem>>, vector<8x33xf32>
    %c0_1 = arith.constant 0 : index
    %c0_2 = arith.constant 0 : index
    %1 = vector.load %arg2[%c0_1, %c0_2] : memref<33x256xf32, #tpu.memory_space<vmem>>, vector<33x256xf32>
    %cst = arith.constant dense<0.000000e+00> : vector<8x256xf32>
    %2 = tpu.matmul %0, %1, %cst {dimension_numbers = #tpu.dot_dimension_numbers<[1], [0], [0], [1], [0, 0, 1, 1], [], []>} : vector<8x33xf32>, vector<33x256xf32>, vector<8x256xf32> -> vector<8x256xf32>
    %c0_3 = arith.constant 0 : index
    %c0_4 = arith.constant 0 : index
    %3 = vector.load %arg3[%c0_3, %c0_4] : memref<1x256xf32, #tpu.memory_space<vmem>>, vector<1x256xf32>
    %4 = vector.broadcast %3 : vector<1x256xf32> to vector<8x256xf32>
    %5 = arith.addf %2, %4 : vector<8x256xf32>
    %cst_5 = arith.constant 0.000000e+00 : f32
    %6 = vector.broadcast %cst_5 : f32 to vector<8x256xf32>
    %7 = arith.maximumf %5, %6 : vector<8x256xf32>
    %8 = vector.extract_strided_slice %7 {offsets = [0, 0], sizes = [8, 128], strides = [1, 1]} : vector<8x256xf32> to vector<8x128xf32>
    %9 = vector.extract_strided_slice %7 {offsets = [0, 128], sizes = [8, 128], strides = [1, 1]} : vector<8x256xf32> to vector<8x128xf32>
    %c0_6 = arith.constant 0 : index
    %c0_7 = arith.constant 0 : index
    %10 = vector.load %arg4[%c0_6, %c0_7] : memref<128x128xf32, #tpu.memory_space<vmem>>, vector<128x128xf32>
    %cst_8 = arith.constant dense<0.000000e+00> : vector<8x128xf32>
    %11 = tpu.matmul %8, %10, %cst_8 {dimension_numbers = #tpu.dot_dimension_numbers<[1], [0], [0], [1], [0, 0, 1, 1], [], []>} : vector<8x128xf32>, vector<128x128xf32>, vector<8x128xf32> -> vector<8x128xf32>
    %c0_9 = arith.constant 0 : index
    %c0_10 = arith.constant 0 : index
    %12 = vector.load %arg6[%c0_9, %c0_10] : memref<1x128xf32, #tpu.memory_space<vmem>>, vector<1x128xf32>
    %13 = vector.broadcast %12 : vector<1x128xf32> to vector<8x128xf32>
    %14 = arith.addf %11, %13 : vector<8x128xf32>
    %cst_11 = arith.constant 0.000000e+00 : f32
    %15 = vector.broadcast %cst_11 : f32 to vector<8x128xf32>
    %16 = arith.maximumf %14, %15 : vector<8x128xf32>
    %c0_12 = arith.constant 0 : index
    %c0_13 = arith.constant 0 : index
    %17 = vector.load %arg5[%c0_12, %c0_13] : memref<128x128xf32, #tpu.memory_space<vmem>>, vector<128x128xf32>
    %cst_14 = arith.constant dense<0.000000e+00> : vector<8x128xf32>
    %18 = tpu.matmul %9, %17, %cst_14 {dimension_numbers = #tpu.dot_dimension_numbers<[1], [0], [0], [1], [0, 0, 1, 1], [], []>} : vector<8x128xf32>, vector<128x128xf32>, vector<8x128xf32> -> vector<8x128xf32>
    %c0_15 = arith.constant 0 : index
    %c0_16 = arith.constant 0 : index
    %19 = vector.load %arg7[%c0_15, %c0_16] : memref<1x128xf32, #tpu.memory_space<vmem>>, vector<1x128xf32>
    %20 = vector.broadcast %19 : vector<1x128xf32> to vector<8x128xf32>
    %21 = arith.addf %18, %20 : vector<8x128xf32>
    %cst_17 = arith.constant 0.000000e+00 : f32
    %22 = vector.broadcast %cst_17 : f32 to vector<8x128xf32>
    %23 = arith.maximumf %21, %22 : vector<8x128xf32>
    %c0_18 = arith.constant 0 : index
    %c0_19 = arith.constant 0 : index
    %24 = vector.load %arg8[%c0_18, %c0_19] : memref<128x128xf32, #tpu.memory_space<vmem>>, vector<128x128xf32>
    %cst_20 = arith.constant dense<0.000000e+00> : vector<8x128xf32>
    %25 = tpu.matmul %16, %24, %cst_20 {dimension_numbers = #tpu.dot_dimension_numbers<[1], [0], [0], [1], [0, 0, 1, 1], [], []>} : vector<8x128xf32>, vector<128x128xf32>, vector<8x128xf32> -> vector<8x128xf32>
    %c0_21 = arith.constant 0 : index
    %c0_22 = arith.constant 0 : index
    %26 = vector.load %arg9[%c0_21, %c0_22] : memref<128x128xf32, #tpu.memory_space<vmem>>, vector<128x128xf32>
    %cst_23 = arith.constant dense<0.000000e+00> : vector<8x128xf32>
    %27 = tpu.matmul %23, %26, %cst_23 {dimension_numbers = #tpu.dot_dimension_numbers<[1], [0], [0], [1], [0, 0, 1, 1], [], []>} : vector<8x128xf32>, vector<128x128xf32>, vector<8x128xf32> -> vector<8x128xf32>
    %28 = arith.addf %25, %27 : vector<8x128xf32>
    %c0_24 = arith.constant 0 : index
    %c0_25 = arith.constant 0 : index
    %29 = vector.load %arg10[%c0_24, %c0_25] : memref<1x128xf32, #tpu.memory_space<vmem>>, vector<1x128xf32>
    %30 = vector.broadcast %29 : vector<1x128xf32> to vector<8x128xf32>
    %31 = arith.addf %28, %30 : vector<8x128xf32>
    %32 = tpu.iota {dimensions = array<i32: 1>} : vector<8x128xi32>
    %c4_i32 = arith.constant 4 : i32
    %33 = vector.broadcast %c4_i32 : i32 to vector<8x128xi32>
    %34 = arith.cmpi slt, %32, %33 : vector<8x128xi32>
    %35 = math.tanh %31 : vector<8x128xf32>
    %36 = arith.select %34, %35, %31 : vector<8x128xi1>, vector<8x128xf32>
    %c0_26 = arith.constant 0 : index
    %c0_27 = arith.constant 0 : index
    %37 = vector.load %arg11[%c0_26, %c0_27] : memref<8x128xf32, #tpu.memory_space<vmem>>, vector<8x128xf32>
    tpu.vector_store %arg11[%c0_26, %c0_27], %36 {strides = array<i32>} : memref<8x128xf32, #tpu.memory_space<vmem>>, vector<8x128xf32>,
    return
  }
  func.func @transform_0(%arg0: i32) -> (i32, i32) {
    %c0_i32 = arith.constant 0 : i32
    %c0_i32_0 = arith.constant 0 : i32
    return %arg0, %c0_i32 : i32, i32
  }
  func.func @transform_1(%arg0: i32) -> (i32, i32) {
    %c0_i32 = arith.constant 0 : i32
    %c0_i32_0 = arith.constant 0 : i32
    %c0_i32_1 = arith.constant 0 : i32
    return %c0_i32, %c0_i32_0 : i32, i32
  }
  func.func @transform_2(%arg0: i32) -> (i32, i32) {
    %c0_i32 = arith.constant 0 : i32
    %c0_i32_0 = arith.constant 0 : i32
    %c0_i32_1 = arith.constant 0 : i32
    return %c0_i32, %c0_i32_0 : i32, i32
  }
  func.func @transform_3(%arg0: i32) -> (i32, i32) {
    %c0_i32 = arith.constant 0 : i32
    %c0_i32_0 = arith.constant 0 : i32
    %c0_i32_1 = arith.constant 0 : i32
    return %c0_i32, %c0_i32_0 : i32, i32
  }
  func.func @transform_4(%arg0: i32) -> (i32, i32) {
    %c0_i32 = arith.constant 0 : i32
    %c0_i32_0 = arith.constant 0 : i32
    %c0_i32_1 = arith.constant 0 : i32
    return %c0_i32, %c0_i32_0 : i32, i32
  }
  func.func @transform_5(%arg0: i32) -> (i32, i32) {
    %c0_i32 = arith.constant 0 : i32
    %c0_i32_0 = arith.constant 0 : i32
    %c0_i32_1 = arith.constant 0 : i32
    return %c0_i32, %c0_i32_0 : i32, i32
  }
  func.func @transform_6(%arg0: i32) -> (i32, i32) {
    %c0_i32 = arith.constant 0 : i32
    %c0_i32_0 = arith.constant 0 : i32
    %c0_i32_1 = arith.constant 0 : i32
    return %c0_i32, %c0_i32_0 : i32, i32
  }
  func.func @transform_7(%arg0: i32) -> (i32, i32) {
    %c0_i32 = arith.constant 0 : i32
    %c0_i32_0 = arith.constant 0 : i32
    %c0_i32_1 = arith.constant 0 : i32
    return %c0_i32, %c0_i32_0 : i32, i32
  }
  func.func @transform_8(%arg0: i32) -> (i32, i32) {
    %c0_i32 = arith.constant 0 : i32
    %c0_i32_0 = arith.constant 0 : i32
    %c0_i32_1 = arith.constant 0 : i32
    return %c0_i32, %c0_i32_0 : i32, i32
  }
  func.func @transform_9(%arg0: i32) -> (i32, i32) {
    %c0_i32 = arith.constant 0 : i32
    %c0_i32_0 = arith.constant 0 : i32
    %c0_i32_1 = arith.constant 0 : i32
    return %c0_i32, %c0_i32_0 : i32, i32
  }
  func.func @transform_10(%arg0: i32) -> (i32, i32) {
    %c0_i32 = arith.constant 0 : i32
    %c0_i32_0 = arith.constant 0 : i32
    return %arg0, %c0_i32 : i32, i32
  }
}

</mosaic_0001>

<bundles_post_ra>
// kernel: tpu_custom_call.1
= control target key start
LH: loop header
LB: loop body
LE: loop exit
PB: predicated region body
PF: predicated region fallthrough
CT: control target
= control target key end

     0   :  { %15 = vsyncpa [#allocation3], 0  ;;  %s1335_s0 = inlined_call_operand.hbm [shape: f32[8,33], index: 0, kind: input, shape index: {}]   ;;  %s1336_s1 = inlined_call_operand.hbm [shape: f32[33,256], index: 1, kind: input, shape index: {}]   ;;  %s1337_s2 = inlined_call_operand.vmem [shape: f32[1,256], index: 2, kind: input, shape index: {}]   ;;  %s1338_s3 = inlined_call_operand.hbm [shape: f32[128,128], index: 3, kind: input, shape index: {}]   ;;  %s1339_s4 = inlined_call_operand.hbm [shape: f32[128,128], index: 4, kind: input, shape index: {}]   ;;  %s1340_s5 = inlined_call_operand.vmem [shape: f32[1,128], index: 5, kind: input, shape index: {}]   ;;  %s1341_s6 = inlined_call_operand.vmem [shape: f32[1,128], index: 6, kind: input, shape index: {}]   ;;  %s1342_s7 = inlined_call_operand.hbm [shape: f32[128,128], index: 7, kind: input, shape index: {}]   ;;  %s1343_s8 = inlined_call_operand.hbm [shape: f32[128,128], index: 8, kind: input, shape index: {}]   ;;  %s1344_s9 = inlined_call_operand.vmem [shape: f32[1,128], index: 9, kind: input, shape index: {}]   ;;  %s1345_s10 = inlined_call_operand.hbm [shape: f32[8,128], index: 10, kind: output, shape index: {}]  }
   0x1   :  { %16 = vsyncpa [#allocation6], 0 }
   0x2   :  { %17 = vsyncpa [#allocation9], 0 }
   0x3   :  { %18 = vsyncpa [#allocation12], 0 }
   0x4   :  { %19 = vsyncpa [#allocation4], 0  ;;  %s1113_s13 = smov [#allocation5]   ;;  %s949_s17 = scalar_lea.hbm %s1336_s1, 1280 }
   0x5   :  { %s35_s14 = sshll.u32 %s1113_s13, 4  ;;  %p950_p0 = scmp.ne.s32.totalorder %s1336_s1, %s949_s17  ;;  %s36_s14 = int_to_ptr.vmem [resolvable:$true] %s35_s14 }
   0x6   :  { %p953_p1 = scmp.lt.u32.totalorder %s949_s17, %s1336_s1 }
   0x8   :  { %p955_p2 = pnand %p953_p1, %p950_p0 }
   0xa   :  { %958 = shalt.err (!%p955_p2)
}
   0xb   :  { %s959_s22 = scalar_lea.vmem %s36_s14, 1280  ;;  %p964_p4 = scmp.lt.s32.totalorder %s36_s14, %s36_s14 }
   0xc   :  { %p960_p3 = scmp.ne.s32.totalorder %s36_s14, %s959_s22  ;;  %p965_p5 = scmp.lt.s32.totalorder %s959_s22, %s959_s22 }
   0xe   :  { %p966_p6 = por %p965_p5, %p964_p4 }
  0x10   :  { %p967_p7 = pnand %p966_p6, %p960_p3 }
  0x12   :  { %970 = shalt.err (!%p967_p7)
}
  0x13   :  { %s1114_s23 = smov 256   ;;  %s1115_s24 = smov 16  }
  0x14   :  { %41 = dma.hbm_to_vmem [thread:$0]  %s1336_s1, 1280, %s36_s14, [#allocation6], %s1114_s23, %s1114_s23, %s1115_s24  }
  0x15   :  { %s1116_s27 = smov [#allocation8]   ;;  %s1117_s29 = smov [#allocation2]  }
  0x16   :  { %s61_s28 = sshll.u32 %s1116_s27, 4  ;;  %s26_s30 = sshll.u32 %s1117_s29, 4  ;;  %s62_s28 = int_to_ptr.vmem [resolvable:$true] %s61_s28  ;;  %s27_s30 = int_to_ptr.vmem [resolvable:$true] %s26_s30 }
  0x17   :  { %s971_s13 = scalar_lea.hbm %s1339_s4, 2048 }
  0x18   :  { %p972_p8 = scmp.ne.s32.totalorder %s1339_s4, %s971_s13  ;;  %p975_p9 = scmp.lt.u32.totalorder %s971_s13, %s1339_s4 }
  0x1a   :  { %p977_p10 = pnand %p975_p9, %p972_p8 }
  0x1c   :  { %980 = shalt.err (!%p977_p10)
}
  0x1d   :  { %s981_s1 = scalar_lea.vmem %s62_s28, 2048  ;;  %p986_p12 = scmp.lt.s32.totalorder %s62_s28, %s62_s28 }
  0x1e   :  { %p982_p11 = scmp.ne.s32.totalorder %s62_s28, %s981_s1  ;;  %p987_p13 = scmp.lt.s32.totalorder %s981_s1, %s981_s1 }
  0x20   :  { %p988_p0 = por %p987_p13, %p986_p12 }
  0x22   :  { %p989_p1 = pnand %p988_p0, %p982_p11 }
  0x24   :  { %992 = shalt.err (!%p989_p1)
}
  0x25   :  { %s1118_s14 = smov 128   ;;  %s1119_s19 = smov 8  }
  0x26   :  { %67 = dma.hbm_to_vmem [thread:$0]  %s1339_s4, 2048, %s62_s28, [#allocation9], %s1118_s14, %s1118_s14, %s1119_s19  }
  0x27   :  { %s993_s24 = scalar_lea.hbm %s1335_s0, 128 }
  0x28   :  { %p994_p2 = scmp.ne.s32.totalorder %s1335_s0, %s993_s24  ;;  %p997_p3 = scmp.lt.u32.totalorder %s993_s24, %s1335_s0 }
  0x2a   :  { %p999_p4 = pnand %p997_p3, %p994_p2 }
  0x2c   :  { %1002 = shalt.err (!%p999_p4)
}
  0x2d   :  { %s1003_s11 = scalar_lea.vmem %s27_s30, 128  ;;  %p1008_p6 = scmp.lt.s32.totalorder %s27_s30, %s27_s30 }
  0x2e   :  { %p1004_p5 = scmp.ne.s32.totalorder %s27_s30, %s1003_s11  ;;  %p1009_p7 = scmp.lt.s32.totalorder %s1003_s11, %s1003_s11 }
  0x30   :  { %p1010_p8 = por %p1009_p7, %p1008_p6 }
  0x32   :  { %p1011_p9 = pnand %p1010_p8, %p1004_p5 }
  0x34   :  { %1014 = shalt.err (!%p1011_p9)
}
  0x35   :  { %29 = dma.hbm_to_vmem [thread:$0]  %s1335_s0, 128, %s27_s30, [#allocation3]  }
  0x36   :  { %s1120_s12 = smov [#allocation7]   ;;  %s1121_s15 = smov [#allocation10]  }
  0x37   :  { %s49_s13 = sshll.u32 %s1120_s12, 4  ;;  %s77_s16 = sshll.u32 %s1121_s15, 4  ;;  %s50_s13 = int_to_ptr.vmem [resolvable:$true] %s49_s13  ;;  %s78_s16 = int_to_ptr.vmem [resolvable:$true] %s77_s16 }
  0x38   :  { %s1015_s1 = scalar_lea.hbm %s1338_s3, 2048 }
  0x39   :  { %p1016_p10 = scmp.ne.s32.totalorder %s1338_s3, %s1015_s1  ;;  %p1019_p11 = scmp.lt.u32.totalorder %s1015_s1, %s1338_s3 }
  0x3b   :  { %p1021_p12 = pnand %p1019_p11, %p1016_p10 }
  0x3d   :  { %1024 = shalt.err (!%p1021_p12)
}
  0x3e   :  { %s1025_s0 = scalar_lea.vmem %s50_s13, 2048  ;;  %p1030_p0 = scmp.lt.s32.totalorder %s50_s13, %s50_s13 }
  0x3f   :  { %p1026_p13 = scmp.ne.s32.totalorder %s50_s13, %s1025_s0  ;;  %p1031_p1 = scmp.lt.s32.totalorder %s1025_s0, %s1025_s0 }
  0x41   :  { %p1032_p2 = por %p1031_p1, %p1030_p0 }
  0x43   :  { %p1033_p3 = pnand %p1032_p2, %p1026_p13 }
  0x45   :  { %1036 = shalt.err (!%p1033_p3)
}
  0x46   :  { %55 = dma.hbm_to_vmem [thread:$0]  %s1338_s3, 2048, %s50_s13, [#allocation6], %s1118_s14, %s1118_s14, %s1119_s19  }
  0x47   :  { %s1037_s27 = scalar_lea.hbm %s1342_s7, 2048 }
  0x48   :  { %p1038_p4 = scmp.ne.s32.totalorder %s1342_s7, %s1037_s27  ;;  %p1041_p5 = scmp.lt.u32.totalorder %s1037_s27, %s1342_s7 }
  0x4a   :  { %p1043_p6 = pnand %p1041_p5, %p1038_p4 }
  0x4c   :  { %1046 = shalt.err (!%p1043_p6)
}
  0x4d   :  { %s1047_s12 = scalar_lea.vmem %s78_s16, 2048  ;;  %p1052_p8 = scmp.lt.s32.totalorder %s78_s16, %s78_s16 }
  0x4e   :  { %p1048_p7 = scmp.ne.s32.totalorder %s78_s16, %s1047_s12  ;;  %p1053_p9 = scmp.lt.s32.totalorder %s1047_s12, %s1047_s12 }
  0x50   :  { %p1054_p10 = por %p1053_p9, %p1052_p8 }
  0x52   :  { %p1055_p11 = pnand %p1054_p10, %p1048_p7 }
  0x54   :  { %1058 = shalt.err (!%p1055_p11)
}
  0x55   :  { %83 = dma.hbm_to_vmem [thread:$0]  %s1342_s7, 2048, %s78_s16, [#allocation9], %s1118_s14, %s1118_s14, %s1119_s19  }
  0x56   :  { %s1122_s15 = smov [#allocation11]   ;;  %s1059_s20 = scalar_lea.hbm %s1343_s8, 2048 }
  0x57   :  { %s89_s17 = sshll.u32 %s1122_s15, 4  ;;  %p1060_p12 = scmp.ne.s32.totalorder %s1343_s8, %s1059_s20  ;;  %s90_s17 = int_to_ptr.vmem [resolvable:$true] %s89_s17 }
  0x58   :  { %p1063_p13 = scmp.lt.u32.totalorder %s1059_s20, %s1343_s8 }
  0x5a   :  { %p1065_p0 = pnand %p1063_p13, %p1060_p12 }
  0x5c   :  { %1068 = shalt.err (!%p1065_p0)
}
  0x5d   :  { %s1069_s30 = scalar_lea.vmem %s90_s17, 2048  ;;  %p1074_p2 = scmp.lt.s32.totalorder %s90_s17, %s90_s17 }
  0x5e   :  { %p1070_p1 = scmp.ne.s32.totalorder %s90_s17, %s1069_s30  ;;  %p1075_p3 = scmp.lt.s32.totalorder %s1069_s30, %s1069_s30 }
  0x60   :  { %p1076_p4 = por %p1075_p3, %p1074_p2 }
  0x62   :  { %p1077_p5 = pnand %p1076_p4, %p1070_p1 }
  0x64   :  { %1080 = shalt.err (!%p1077_p5)
}
  0x65   :  { %95 = dma.hbm_to_vmem [thread:$0]  %s1343_s8, 2048, %s90_s17, [#allocation12], %s1118_s14, %s1118_s14, %s1119_s19  }
  0x66   :  { %1103 = dma.done.wait [#allocation3], 128  }
  0x67   :  { %1104 = vsyncadd [#allocation3], 4294967168 }
  0x68   :  { %1105 = dma.done.wait [#allocation6], 3328  }
  0x69   :  { %1106 = vsyncadd [#allocation6], 4294963968 }
  0x6a   :  { %1107 = dma.done.wait [#allocation9], 4096  }
  0x6b   :  { %1108 = vsyncadd [#allocation9], 4294963200 }
  0x6c   :  { %1109 = dma.done.wait [#allocation12], 2048  }
  0x6d   :  { %1110 = vsyncadd [#allocation12], 4294965248  ;;  %v1123_v0 = vmov 0.0   ;;  %v1124_v1 = vmov 0.0|0.0   ;;  %v118_v2 = vld [vmem:[#allocation5 + $0x8] sm:$0xff]  ;;  %v120_v3 = vld [vmem:[#allocation5 + $0x18] sm:$0xff] }
  0x6e   :  { %214 = vmatprep.mubr.f32.mxu0 %v1123_v0  ;;  %837 = vmatprep.subr.bf16.mxu1 %v1124_v1  ;;  %v117_v4 = vld [vmem:[#allocation5] sm:$0xff]  ;;  %v829_v5 = vpack.c.bf16 %v120_v3, %v118_v2  ;;  %v119_v6 = vld [vmem:[#allocation5 + $0x10] sm:$0xff]  ;;  %v122_v7 = vld [vmem:[#allocation5 + $0x28] sm:$0xff]  ;;  %vm143_vm0 = vcmask 1040384   ;;  %vm139_vm1 = vcmask 269312   ;;  %vm1125_vm2 = vmmov 0  }
  0x6f   :  { %v124_v8 = vld [vmem:[#allocation5 + $0x38] sm:$0xff]  ;;  %v831_v9 = vpack.c.bf16 %v119_v6, %v117_v4  ;;  %v121_v11 = vld [vmem:[#allocation5 + $0x20] sm:$0xff]  ;;  %v123_v12 = vld [vmem:[#allocation5 + $0x30] sm:$0xff]  ;;  %721 = vmatprep.mubr.msk.f32.mxu1 %vm1125_vm2, %v1123_v0  ;;  %v129_v3 = vlaneseq }
  0x70   :  { %v833_v10 = vpack.c.bf16 %v124_v8, %v122_v7  ;;  %830 = vmatprep.subr.bf16.mxu0 %v829_v5  ;;  %v223_v13 = vld [vmem:[#allocation7] sm:$0xff]  ;;  %v835_v14 = vpack.c.bf16 %v123_v12, %v121_v11  ;;  %v224_v15 = vld [vmem:[#allocation7 + $0x8] sm:$0xff]  ;;  %v225_v17 = vld [vmem:[#allocation7 + $0x10] sm:$0xff] }
  0x71   :  { %832 = vmatpush1.bf16.msra.mxu0 %v831_v9  ;;  %v838_v16 = vpack.c.bf16 %v224_v15, %v223_v13  ;;  %v226_v18 = vld [vmem:[#allocation7 + $0x18] sm:$0xff]  ;;  %v317_v20 = vld [vmem:[#allocation8] sm:$0xff]  ;;  %v318_v21 = vld [vmem:[#allocation8 + $0x8] sm:$0xff]  ;;  %v130_v4 = vshrl.u32 %v129_v3, 7 }
  0x72   :  { %834 = vmatprep.subr.bf16.mxu0 %v833_v10  ;;  %v126_v19 = vld [vmem:[#allocation5 + $0x48] sm:$0x1]  ;;  %v841_v22 = vpack.c.bf16 %v226_v18, %v225_v17  ;;  %v227_v23 = vld [vmem:[#allocation7 + $0x20] sm:$0xff]  ;;  %v228_v24 = vld [vmem:[#allocation7 + $0x28] sm:$0xff]  ;;  %v862_v27 = vpack.c.bf16 %v318_v21, %v317_v20 }
  0x73   :  { %839 = vmatpush3.bf16.msra.mxu1 %v838_v16  ;;  %v125_v25 = vld [vmem:[#allocation5 + $0x40] sm:$0x1]  ;;  %v116_v26 = vld [vmem:[#allocation2] sm:$0xff]  ;;  %v320_v29 = vld [vmem:[#allocation8 + $0x18] sm:$0xff]  ;;  %v844_v30 = vpack.c.bf16 %v228_v24, %v227_v23  ;;  %v131_v5 = vsub.s32 0, %v130_v4  ;;  %v135_v7 = vsub.s32 1, %v130_v4 }
  0x74   :  { %840 = vmatprep.subr.bf16.mxu1 %v1124_v1  ;;  %v319_v28 = vld [vmem:[#allocation8 + $0x10] sm:$0xff]  ;;  %v230_v32 = vld [vmem:[#allocation7 + $0x38] sm:$0xff]  ;;  %v321_v34 = vld [vmem:[#allocation8 + $0x20] sm:$0xff] }
  0x75   :  { %836 = vmatpush1.bf16.msra.mxu0 %v835_v14  ;;  %v229_v31 = vld [vmem:[#allocation7 + $0x30] sm:$0xff]  ;;  %v865_v33 = vpack.c.bf16 %v320_v29, %v319_v28  ;;  %v322_v35 = vld [vmem:[#allocation8 + $0x28] sm:$0xff]  ;;  %v231_v37 = vld [vmem:[#allocation7 + $0x40] sm:$0xff] }
  0x76   :  { %615 = vmatprep.subr.msk.mxu0 %vm143_vm0, %v126_v19  ;;  %v847_v36 = vpack.c.bf16 %v230_v32, %v229_v31  ;;  %v232_v38 = vld [vmem:[#allocation7 + $0x48] sm:$0xff]  ;;  %v868_v39 = vpack.c.bf16 %v322_v35, %v321_v34  ;;  %v323_v40 = vld [vmem:[#allocation8 + $0x30] sm:$0xff]  ;;  %v324_v41 = vld [vmem:[#allocation8 + $0x38] sm:$0xff] }
  0x77   :  { %842 = vmatpush3.bf16.msra.mxu1 %v841_v22  ;;  %v850_v42 = vpack.c.bf16 %v232_v38, %v231_v37  ;;  %v233_v43 = vld [vmem:[#allocation7 + $0x50] sm:$0xff]  ;;  %v234_v44 = vld [vmem:[#allocation7 + $0x58] sm:$0xff]  ;;  %v871_v45 = vpack.c.bf16 %v324_v41, %v323_v40  ;;  %v325_v46 = vld [vmem:[#allocation8 + $0x40] sm:$0xff] }
  0x78   :  { %843 = vmatprep.subr.bf16.mxu1 %v1124_v1  ;;  %v326_v47 = vld [vmem:[#allocation8 + $0x48] sm:$0xff]  ;;  %v853_v48 = vpack.c.bf16 %v234_v44, %v233_v43  ;;  %v235_v49 = vld [vmem:[#allocation7 + $0x60] sm:$0xff]  ;;  %v327_v52 = vld [vmem:[#allocation8 + $0x50] sm:$0xff] }
  0x79   :  { %616 = vmatpush1.msk.msra.mxu0 %vm143_vm0, %v125_v25  ;;  %v236_v50 = vld [vmem:[#allocation7 + $0x68] sm:$0xff]  ;;  %v874_v51 = vpack.c.bf16 %v326_v47, %v325_v46  ;;  %v328_v53 = vld [vmem:[#allocation8 + $0x58] sm:$0xff]  ;;  %v329_v56 = vld [vmem:[#allocation8 + $0x60] sm:$0xff] }
  0x7a   :  { %617 = vmatmul.mubr.msk.f32.vlgmr.msra.gmra.mrb[0].mxu0 %vm139_vm1, %v116_v26  ;;  %861 = vmatprep.subr.bf16.mxu0 %v1124_v1  ;;  %v856_v54 = vpack.c.bf16 %v236_v50, %v235_v49  ;;  %v877_v55 = vpack.c.bf16 %v328_v53, %v327_v52  ;;  %v330_v57 = vld [vmem:[#allocation8 + $0x68] sm:$0xff]  ;;  %v237_v59 = vld [vmem:[#allocation7 + $0x70] sm:$0xff]  ;;  %v238_v60 = vld [vmem:[#allocation7 + $0x78] sm:$0xff] }
  0x7b   :  { %863 = vmatpush3.bf16.msra.mxu0 %v862_v27  ;;  %845 = vmatpush3.bf16.msra.mxu1 %v844_v30  ;;  %v880_v58 = vpack.c.bf16 %v330_v57, %v329_v56  ;;  %v859_v61 = vpack.c.bf16 %v238_v60, %v237_v59  ;;  %v331_v62 = vld [vmem:[#allocation8 + $0x70] sm:$0xff]  ;;  %v332_v63 = vld [vmem:[#allocation8 + $0x78] sm:$0xff]  ;;  %v127_v6 = vld [vmem:[%s1337_s2] sm:$0x3] }
  0x7c   :  { %864 = vmatprep.subr.bf16.mxu0 %v1124_v1  ;;  %846 = vmatprep.subr.bf16.mxu1 %v1124_v1  ;;  %v883_v2 = vpack.c.bf16 %v332_v63, %v331_v62  ;;  %v132_v8 = vrot.slane %v127_v6, %v131_v5  ;;  %v136_v9 = vrot.slane %v127_v6, %v135_v7  ;;  %v427_v10 = vld [vmem:[#allocation11] sm:$0xff]  ;;  %v428_v11 = vld [vmem:[#allocation11 + $0x8] sm:$0xff]  ;;  %v429_v21 = vld [vmem:[#allocation11 + $0x10] sm:$0xff] }
  0x7d   :  { %756 = vmatprep.mubr.msk.f32.mxu0 %vm1125_vm2, %v1123_v0  ;;  %v411_v13 = vld [vmem:[#allocation10] sm:$0xff]  ;;  %v412_v14 = vld [vmem:[#allocation10 + $0x8] sm:$0xff]  ;;  %v886_v18 = vpack.c.bf16 %v428_v11, %v427_v10  ;;  %v430_v22 = vld [vmem:[#allocation11 + $0x18] sm:$0xff] }
  0x7e   :  { %v910_v20 = vpack.c.bf16 %v412_v14, %v411_v13  ;;  %v413_v24 = vld [vmem:[#allocation10 + $0x10] sm:$0xff]  ;;  %v414_v25 = vld [vmem:[#allocation10 + $0x18] sm:$0xff]  ;;  %v889_v26 = vpack.c.bf16 %v430_v22, %v429_v21  ;;  %v431_v28 = vld [vmem:[#allocation11 + $0x20] sm:$0xff] }
  0x7f   :  { %866 = vmatpush3.bf16.msra.mxu0 %v865_v33  ;;  %848 = vmatpush3.bf16.msra.mxu1 %v847_v36  ;;  %v913_v27 = vpack.c.bf16 %v414_v25, %v413_v24  ;;  %v432_v29 = vld [vmem:[#allocation11 + $0x28] sm:$0xff]  ;;  %v415_v30 = vld [vmem:[#allocation10 + $0x20] sm:$0xff]  ;;  %v433_v34 = vld [vmem:[#allocation11 + $0x30] sm:$0xff] }
  0x80   :  { %867 = vmatprep.subr.bf16.mxu0 %v1124_v1  ;;  %849 = vmatprep.subr.bf16.mxu1 %v1124_v1  ;;  %v416_v31 = vld [vmem:[#allocation10 + $0x28] sm:$0xff]  ;;  %v892_v32 = vpack.c.bf16 %v432_v29, %v431_v28  ;;  %v434_v35 = vld [vmem:[#allocation11 + $0x38] sm:$0xff]  ;;  %v417_v36 = vld [vmem:[#allocation10 + $0x30] sm:$0xff] }
  0x81   :  { %v916_v33 = vpack.c.bf16 %v416_v31, %v415_v30  ;;  %v418_v37 = vld [vmem:[#allocation10 + $0x38] sm:$0xff]  ;;  %v895_v38 = vpack.c.bf16 %v434_v35, %v433_v34  ;;  %v435_v40 = vld [vmem:[#allocation11 + $0x40] sm:$0xff]  ;;  %v421_v47 = vld [vmem:[#allocation10 + $0x50] sm:$0xff] }
  0x82   :  { %v419_v41 = vld [vmem:[#allocation10 + $0x40] sm:$0xff]  ;;  %v438_v46 = vld [vmem:[#allocation11 + $0x58] sm:$0xff]  ;;  %v440_v52 = vld [vmem:[#allocation11 + $0x68] sm:$0xff] }
  0x83   :  { %869 = vmatpush3.bf16.msra.mxu0 %v868_v39  ;;  %851 = vmatpush3.bf16.msra.mxu1 %v850_v42  ;;  %v919_v39 = vpack.c.bf16 %v418_v37, %v417_v36  ;;  %v420_v42 = vld [vmem:[#allocation10 + $0x48] sm:$0xff]  ;;  %v423_v53 = vld [vmem:[#allocation10 + $0x60] sm:$0xff]  ;;  %v425_v57 = vld [vmem:[#allocation10 + $0x70] sm:$0xff] }
  0x84   :  { %870 = vmatprep.subr.bf16.mxu0 %v1124_v1  ;;  %852 = vmatprep.subr.bf16.mxu1 %v1124_v1  ;;  %v922_v44 = vpack.c.bf16 %v420_v42, %v419_v41  ;;  %v441_v60 = vld [vmem:[#allocation11 + $0x70] sm:$0xff]  ;;  %v618_v63 = vld [vmem:[%s1340_s5] ss:$0 sm:$0xff]  ;;  %s1126_s5 = smov [#allocation13]  }
  0x85   :  { %v620_v13 = vld [vmem:[%s1344_s9] ss:$0 sm:$0xff] }
  0x87   :  { %872 = vmatpush3.bf16.msra.mxu0 %v871_v45  ;;  %854 = vmatpush3.bf16.msra.mxu1 %v853_v48  ;;  %v437_v45 = vld [vmem:[#allocation11 + $0x50] sm:$0xff]  ;;  %v422_v48 = vld [vmem:[#allocation10 + $0x58] sm:$0xff] }
  0x88   :  { %873 = vmatprep.subr.bf16.mxu0 %v1124_v1  ;;  %855 = vmatprep.subr.bf16.mxu1 %v1124_v1  ;;  %v901_v49 = vpack.c.bf16 %v438_v46, %v437_v45  ;;  %v925_v50 = vpack.c.bf16 %v422_v48, %v421_v47 }
  0x8b   :  { %875 = vmatpush3.bf16.msra.mxu0 %v874_v51  ;;  %857 = vmatpush3.bf16.msra.mxu1 %v856_v54  ;;  %v439_v51 = vld [vmem:[#allocation11 + $0x60] sm:$0xff]  ;;  %v424_v54 = vld [vmem:[#allocation10 + $0x68] sm:$0xff] }
  0x8c   :  { %876 = vmatprep.subr.bf16.mxu0 %v1124_v1  ;;  %858 = vmatprep.subr.bf16.mxu1 %v1124_v1  ;;  %v928_v56 = vpack.c.bf16 %v424_v54, %v423_v53 }
  0x8f   :  { %878 = vmatpush3.bf16.msra.mxu0 %v877_v55  ;;  %860 = vmatpush3.bf16.msra.mxu1 %v859_v61  ;;  %v904_v55 = vpack.c.bf16 %v440_v52, %v439_v51  ;;  %v442_v61 = vld [vmem:[#allocation11 + $0x78] sm:$0xff] }
  0x90   :  { %879 = vmatprep.subr.bf16.mxu0 %v1124_v1  ;;  %885 = vmatprep.subr.bf16.mxu1 %v1124_v1  ;;  %v907_v62 = vpack.c.bf16 %v442_v61, %v441_v60 }
  0x93   :  { %881 = vmatpush3.bf16.msra.mxu0 %v880_v58  ;;  %v426_v58 = vld [vmem:[#allocation10 + $0x78] sm:$0xff] }
  0x94   :  { %882 = vmatprep.subr.bf16.mxu0 %v1124_v1  ;;  %v931_v59 = vpack.c.bf16 %v426_v58, %v425_v57 }
  0x97   :  { %884 = vmatpush3.bf16.msra.mxu0 %v883_v2  ;;  %v619_v2 = vld [vmem:[%s1341_s6] ss:$0 sm:$0xff]  ;;  %s603_s6 = sshll.u32 %s1126_s5, 4  ;;  %s604_s6 = int_to_ptr.vmem [resolvable:$true] %s603_s6 }
  0x98   :  { %909 = vmatprep.subr.bf16.mxu0 %v1124_v1  ;;  %s1081_s29 = scalar_lea.vmem %s604_s6, 128  ;;  %p1086_p7 = scmp.lt.s32.totalorder %s604_s6, %s604_s6 }
  0x99   :  { %p1082_p6 = scmp.ne.s32.totalorder %s604_s6, %s1081_s29  ;;  %p1087_p8 = scmp.lt.s32.totalorder %s1081_s29, %s1081_s29 }
  0x9b   :  { %p1088_p9 = por %p1087_p8, %p1086_p7 }
  0x9d   :  { %p1089_p10 = pnand %p1088_p9, %p1082_p6 }
 0x14d   :  { %v216_v12 = vpop.f32.mrb[0].mxu0 }
 0x14e   :  { %v217_v15 = vadd.f32 %v216_v12, %v132_v8  ;;  %v218_v16 = vpop.f32.mrb[1].mxu0 }
 0x14f   :  { %v219_v17 = vadd.f32 %v218_v16, %v136_v9 }
 0x150   :  { %v221_v19 = vmax.f32 %v217_v15, 0.0 }
 0x151   :  { %v222_v23 = vmax.f32 %v219_v17, 0.0 }
 0x152   :  { %722 = vmatmul.mubr.f32.vlgmr.msra.gmra.mrb[0].mxu1 %v221_v19 }
 0x153   :  { %757 = vmatmul.mubr.f32.vlgmr.msra.gmra.mrb[2].mxu0 %v222_v23  ;;  %887 = vmatpush3.bf16.msra.mxu1 %v886_v18  ;;  %v592_v18 = vand.u32 127, %v129_v3 }
 0x154   :  { %911 = vmatpush3.bf16.msra.mxu0 %v910_v20  ;;  %888 = vmatprep.subr.bf16.mxu1 %v1124_v1 }
 0x155   :  { %912 = vmatprep.subr.bf16.mxu0 %v1124_v1  ;;  %826 = vmatprep.mubr.msk.f32.mxu0 %vm1125_vm2, %v1123_v0  ;;  %vm593_vm3 = vcmp.lt.s32.totalorder %v592_v18, 4 }
 0x156   :  { %791 = vmatprep.mubr.msk.f32.mxu1 %vm1125_vm2, %v1123_v0  ;;  %v436_v0 = vld [vmem:[#allocation11 + $0x48] sm:$0xff] }
 0x157   :  { %890 = vmatpush3.bf16.msra.mxu1 %v889_v26  ;;  %v898_v43 = vpack.c.bf16 %v436_v0, %v435_v40 }
 0x158   :  { %914 = vmatpush3.bf16.msra.mxu0 %v913_v27  ;;  %891 = vmatprep.subr.bf16.mxu1 %v1124_v1 }
 0x159   :  { %915 = vmatprep.subr.bf16.mxu0 %v1124_v1 }
 0x15b   :  { %893 = vmatpush3.bf16.msra.mxu1 %v892_v32 }
 0x15c   :  { %917 = vmatpush3.bf16.msra.mxu0 %v916_v33  ;;  %894 = vmatprep.subr.bf16.mxu1 %v1124_v1 }
 0x15d   :  { %918 = vmatprep.subr.bf16.mxu0 %v1124_v1 }
 0x15f   :  { %896 = vmatpush3.bf16.msra.mxu1 %v895_v38 }
 0x160   :  { %920 = vmatpush3.bf16.msra.mxu0 %v919_v39  ;;  %897 = vmatprep.subr.bf16.mxu1 %v1124_v1 }
 0x161   :  { %921 = vmatprep.subr.bf16.mxu0 %v1124_v1 }
 0x163   :  { %899 = vmatpush3.bf16.msra.mxu1 %v898_v43 }
 0x164   :  { %923 = vmatpush3.bf16.msra.mxu0 %v922_v44  ;;  %900 = vmatprep.subr.bf16.mxu1 %v1124_v1 }
 0x165   :  { %924 = vmatprep.subr.bf16.mxu0 %v1124_v1 }
 0x167   :  { %902 = vmatpush3.bf16.msra.mxu1 %v901_v49 }
 0x168   :  { %926 = vmatpush3.bf16.msra.mxu0 %v925_v50  ;;  %903 = vmatprep.subr.bf16.mxu1 %v1124_v1 }
 0x169   :  { %927 = vmatprep.subr.bf16.mxu0 %v1124_v1 }
 0x16b   :  { %905 = vmatpush3.bf16.msra.mxu1 %v904_v55 }
 0x16c   :  { %929 = vmatpush3.bf16.msra.mxu0 %v928_v56  ;;  %906 = vmatprep.subr.bf16.mxu1 %v1124_v1 }
 0x16d   :  { %930 = vmatprep.subr.bf16.mxu0 %v1124_v1 }
 0x16f   :  { %908 = vmatpush3.bf16.msra.mxu1 %v907_v62 }
 0x170   :  { %932 = vmatpush3.bf16.msra.mxu0 %v931_v59 }
 0x225   :  { %v312_v4 = vpop.f32.mrb[0].mxu1 }
 0x226   :  { %v313_v5 = vadd.f32 %v618_v63, %v312_v4  ;;  %v723_v6 = vpop.f32.mrb[1].mxu1  ;;  %v406_v1 = vpop.f32.mrb[2].mxu0 }
 0x227   :  { %v407_v7 = vadd.f32 %v619_v2, %v406_v1  ;;  %v758_v8 = vpop.f32.mrb[3].mxu0 }
 0x228   :  { %v316_v9 = vmax.f32 %v313_v5, 0.0 }
 0x229   :  { %v410_v10 = vmax.f32 %v407_v7, 0.0 }
 0x22a   :  { %827 = vmatmul.mubr.f32.vlgmr.msra.gmra.mrb[4].mxu0 %v316_v9 }
 0x22b   :  { %792 = vmatmul.mubr.f32.vlgmr.msra.gmra.mrb[2].mxu1 %v410_v10 }
 0x2fd   :  { %v579_v11 = vpop.f32.mrb[4].mxu0 }
 0x2fe   :  { %v509_v12 = vpop.f32.mrb[2].mxu1  ;;  %v828_v14 = vpop.f32.mrb[5].mxu0 }
 0x2ff   :  { %v580_v15 = vadd.f32 %v579_v11, %v509_v12  ;;  %v793_v16 = vpop.f32.mrb[3].mxu1 }
 0x301   :  { %v590_v17 = vadd.f32 %v620_v13, %v580_v15 }
 0x303   :  { %947 = vtanh.f32 %v590_v17 }
 0x30d   :  { %v948_v19 = vpop.eup %947 }
 0x30e   :  { %v595_v20 = vsel %vm593_vm3, %v948_v19, %v590_v17 }
 0x30f   :  { %596 = vst [vmem:[#allocation13] sm:$0xff] %v595_v20 }
 0x310   :  { %1092 = shalt.err (!%p1089_p10)
}
 0x311   :  { %s1093_s4 = scalar_lea.hbm %s1345_s10, 128 }
 0x312   :  { %p1094_p11 = scmp.ne.s32.totalorder %s1345_s10, %s1093_s4  ;;  %p1097_p12 = scmp.lt.u32.totalorder %s1093_s4, %s1345_s10 }
 0x314   :  { %p1099_p13 = pnand %p1097_p12, %p1094_p11 }
 0x316   :  { %1102 = shalt.err (!%p1099_p13)
}
 0x317   :  { %606 = dma.vmem_to_hbm [thread:$0]  %s604_s6, 128, %s1345_s10, [#allocation4]  }
 0x318   :  { %1111 = dma.done.wait [#allocation4], 128  }
 0x319   :  { %1112 = vsyncadd [#allocation4], 4294967168 }
 0x31a   :  { %610 = vsyncpa [#allocation3], 1 }
 0x31b   :  { %611 = vsyncpa [#allocation6], 1 }
 0x31c   :  { %612 = vsyncpa [#allocation9], 1 }
 0x31d   :  { %613 = vsyncpa [#allocation12], 1 }
 0x31e   :  { %614 = vsyncpa [#allocation4], 1 }

</bundles_post_ra>
